<compile_context>
chip_gen: v5e
topology: v5e:2x2
jax: 0.10.0
libtpu: 0.0.40
codegen_flags: <defaults>
</compile_context>

<pallas_src>
import functools
import math

import jax
import jax.numpy as jnp
from jax.experimental import pallas as pl
from jax.experimental.pallas import tpu as pltpu

BN_EPS = 1e-5


# --------------------------- fused Pallas kernel -----------------------------

def _up_fused_kernel(x1_ref, x2_ref, mhb_ref, kgup_ref, kx_ref, bgx_ref,
                     kpsi_ref, bpsi_ref, kpsirep_ref, s_ref,
                     m1a_ref, m1b_ref, b1_ref, m2_ref, b2_ref, o_ref):
    """Whole forward in one step; batch folded into the sublane (row) axis.

    x1_ref  : (N*Hin, Win*C)   low-res decoder feature
    x2_ref  : (N*H,   W*C)     encoder skip feature
    mhb     : (N*H, N*Hin)     kron(I_N, mh) bilinear row interp (align_corners)
    kgup    : (Win*C, W*Cint)  kron(mw.T, wg): column interp folded into W_g 1x1
    kx      : (W*C, W*Cint)    kron(I_W, wx) 1x1 conv (+folded BN)
    bgx     : (1, W*Cint)      tiled (bg + bx)
    kpsi    : (W*Cint, W)      kron(I_W, wpsi);  bpsi: (1, W)
    kpsirep : (W, W*C)         broadcasts psi across the C channel lanes
    s       : (2, N*H, N*H)    block-diag vertical shift matrices (ky=0 / ky=2)
    m1a/m1b : (3, W*C, W*Cmid) per-ky folded 3-tap conv1 matrices, x2 / gated half
    m2      : (3, W*Cmid, W*Coutp) per-ky conv2 matrices (Cout zero-padded to Coutp)
    b1/b2   : (1, W*Cmid) / (1, W*Coutp) tiled biases
    o_ref   : (N*H, W*Coutp)   lane-dense (multiple of 128) output slab
    """
    f32 = jnp.float32
    x1 = x1_ref[...]                                                  # (rows_in, Win*C)
    x2 = x2_ref[...]                                                  # (rows, W*C)

    # Bilinear upsample (rows) with the column-upsample pre-folded into W_g.
    t = jnp.dot(mhb_ref[...], x1, preferred_element_type=f32)        # (rows, Win*C)
    g1 = jnp.dot(t, kgup_ref[...], preferred_element_type=f32)       # (rows, W*Cint)

    # Attention gate: 1x1 convs as block-diagonal matmuls in the lane layout.
    xl = jnp.dot(x2, kx_ref[...], preferred_element_type=f32)        # (rows, W*Cint)
    a = jnp.maximum(g1 + xl + bgx_ref[...], 0.0)
    psi = jax.nn.sigmoid(jnp.dot(a, kpsi_ref[...], preferred_element_type=f32)
                         + bpsi_ref[...])                             # (rows, W)
    psiC = jnp.dot(psi, kpsirep_ref[...], preferred_element_type=f32)  # (rows, W*C)
    gated = x2 * psiC                                                 # (rows, W*C)

    s0 = s_ref[0]          # out[i] += tap0(in[i-1])
    s2 = s_ref[1]          # out[i] += tap2(in[i+1])

    # conv3x3 "same" + folded BN + ReLU; 9 taps folded into 3 per-ky matrices,
    # conv1 split over the [x2 | gated] concat halves (no explicit cat slab).
    def conv1():
        def tap(ky):
            return (jnp.dot(x2, m1a_ref[ky], preferred_element_type=f32)
                    + jnp.dot(gated, m1b_ref[ky], preferred_element_type=f32))
        acc = tap(1)
        acc = acc + jnp.dot(s0, tap(0), preferred_element_type=f32)
        acc = acc + jnp.dot(s2, tap(2), preferred_element_type=f32)
        return jnp.maximum(acc + b1_ref[...], 0.0)

    h1 = conv1()                                                      # (rows, W*Cmid)

    acc2 = jnp.dot(h1, m2_ref[1], preferred_element_type=f32)
    acc2 = acc2 + jnp.dot(s0, jnp.dot(h1, m2_ref[0], preferred_element_type=f32),
                          preferred_element_type=f32)
    acc2 = acc2 + jnp.dot(s2, jnp.dot(h1, m2_ref[2], preferred_element_type=f32),
                          preferred_element_type=f32)
    o_ref[...] = jnp.maximum(acc2 + b2_ref[...], 0.0)                 # (rows, W*Coutp)


# --------------------------- pallas_call wrapper ------------------------------

@functools.partial(jax.jit, static_argnames=("cout",))
def up_forward(x1_low, x2, fp, *, cout):
    """Up.forward: x1_low (N,Hin,Win,C) NHWC, x2 (N,H,W,C) NHWC, C=in_channels//2."""
    N, Hin, Win, C = x1_low.shape
    _, H, W, C2 = x2.shape
    assert C == C2 and H == 2 * Hin and W == 2 * Win

    rows, rows_in = N * H, N * Hin
    out_w = fp["m2"].shape[2]            # W * Cout_padded (multiple of 128)
    cout_pad = out_w // W

    x1f = x1_low.reshape(rows_in, Win * C)   # contiguous collapse: free
    x2f = x2.reshape(rows, W * C)

    out = pl.pallas_call(
        _up_fused_kernel,
        out_shape=jax.ShapeDtypeStruct((rows, out_w), jnp.float32),
    )(x1f, x2f, fp["mhb"], fp["kgup"], fp["kx"], fp["bgx"], fp["kpsi"],
      fp["bpsi"], fp["kpsirep"], fp["s"], fp["m1a"], fp["m1b"], fp["b1"],
      fp["m2"], fp["b2"])

    return out.reshape(N, H, W, cout_pad)[..., :cout]


# --------------------------- parameter folding (host/XLA, done once) ---------

def _bilinear_matrix(n_out, n_in):
    """1-D bilinear interpolation matrix, align_corners=True (torch Upsample)."""
    i = jnp.arange(n_out, dtype=jnp.float32)
    if n_out > 1 and n_in > 1:
        src = i * (n_in - 1) / (n_out - 1)
    else:
        src = jnp.zeros((n_out,), jnp.float32)
    lo = jnp.clip(jnp.floor(src).astype(jnp.int32), 0, max(n_in - 2, 0))
    frac = src - lo.astype(jnp.float32)
    cols = jnp.arange(n_in)
    m = ((1.0 - frac)[:, None] * (cols[None, :] == lo[:, None])
         + frac[:, None] * (cols[None, :] == (lo + 1)[:, None]))
    return m.astype(jnp.float32)


def fold_params(p, N, Hin, Win, H, W):
    """Pre-build all kernel-ready constant matrices (tiny; computed once)."""
    f32 = jnp.float32
    C = p["wg"].shape[0]

    eyeW = jnp.eye(W, dtype=f32)
    eyeN = jnp.eye(N, dtype=f32)

    mh = _bilinear_matrix(H, Hin)                                    # (H, Hin)
    mw = _bilinear_matrix(W, Win)                                    # (W, Win)
    mhb = jnp.kron(eyeN, mh)                                         # (N*H, N*Hin)

    # Column-upsample folded into W_g:  kron(mw.T, I_C) @ kron(I_W, wg) = kron(mw.T, wg)
    kgup = jnp.kron(mw.T, p["wg"])                                   # (Win*C, W*Cint)
    kx = jnp.kron(eyeW, p["wx"])                                     # (W*C, W*Cint)
    bgx = jnp.tile(p["bg"][0] + p["bx"][0], W)[None, :]              # (1, W*Cint)
    kpsi = jnp.kron(eyeW, p["wpsi"])                                 # (W*Cint, W)
    bpsi = jnp.tile(p["bpsi"][0], W)[None, :]                        # (1, W)
    kpsirep = jnp.kron(eyeW, jnp.ones((1, C), f32))                  # (W, W*C)

    # Vertical halo shifts, block-diagonal over batch (ky=1 identity dropped).
    s = jnp.stack([jnp.kron(eyeN, jnp.eye(H, k=-1, dtype=f32)),      # ky=0
                   jnp.kron(eyeN, jnp.eye(H, k=1, dtype=f32))])      # ky=2

    def conv_mats(w9):
        cin, cout_ = w9.shape[1], w9.shape[2]
        mats = []
        for ky in range(3):
            m = jnp.zeros((W * cin, W * cout_), f32)
            for kx_ in range(3):
                sh = jnp.eye(W, k=1 - kx_, dtype=f32)   # horizontal shift, zero pad
                m = m + jnp.kron(sh, w9[ky * 3 + kx_])
            mats.append(m)
        return jnp.stack(mats)                                       # (3, W*cin, W*cout_)

    # conv1 split over the [x2 | gated] concat halves (channel order matches torch cat).
    m1a = conv_mats(p["w1"][:, :C, :])                               # (3, W*C, W*Cmid)
    m1b = conv_mats(p["w1"][:, C:, :])                               # (3, W*C, W*Cmid)
    b1 = jnp.tile(p["b1"][0], W)[None, :]                            # (1, W*Cmid)

    # conv2: zero-pad Cout so the output slab is lane-dense (multiple of 128 lanes).
    cout = p["w2"].shape[2]
    unit = 128 // math.gcd(W, 128)
    cout_pad = ((cout + unit - 1) // unit) * unit
    w2p = jnp.pad(p["w2"], ((0, 0), (0, 0), (0, cout_pad - cout)))
    m2 = conv_mats(w2p)                                              # (3, W*Cmid, W*Coutp)
    b2 = jnp.tile(jnp.pad(p["b2"][0], (0, cout_pad - cout)), W)[None, :]

    return dict(mhb=mhb, kgup=kgup, kx=kx, bgx=bgx, kpsi=kpsi, bpsi=bpsi,
                kpsirep=kpsirep, s=s, m1a=m1a, m1b=m1b, b1=b1, m2=m2, b2=b2)


def make_params(key, in_channels, out_channels):
    C = in_channels // 2
    Cint = in_channels // 4
    mid = in_channels // 2
    bn_scale = 1.0 / jnp.sqrt(1.0 + BN_EPS)   # BN fold: gamma=1, beta=0, mean=0, var=1
    ks = jax.random.split(key, 10)

    def w(k, shape, s=0.2):
        return (jax.random.normal(k, shape, jnp.float32) * s) * bn_scale

    return {
        "wg": w(ks[0], (C, Cint)),        "bg": w(ks[1], (1, Cint)),
        "wx": w(ks[2], (C, Cint)),        "bx": w(ks[3], (1, Cint)),
        "wpsi": w(ks[4], (Cint, 1)),      "bpsi": w(ks[5], (1, 1)),
        "w1": w(ks[6], (9, 2 * C, mid)),  "b1": w(ks[7], (1, mid)),
        "w2": w(ks[8], (9, mid, out_channels)), "b2": w(ks[9], (1, out_channels)),
    }


# --------------------------- pure-JAX reference ------------------------------

def _ref_forward(x1_low, x2, p):
    N, Hin, Win, C = x1_low.shape
    _, H, W, _ = x2.shape
    mh = _bilinear_matrix(H, Hin)
    mw = _bilinear_matrix(W, Win)
    g = jnp.einsum("ih,jw,nhwc->nijc", mh, mw, x1_low)
    g1 = jnp.einsum("nijc,cf->nijf", g, p["wg"]) + p["bg"][0]
    xl = jnp.einsum("nijc,cf->nijf", x2, p["wx"]) + p["bx"][0]
    a = jnp.maximum(g1 + xl, 0.0)
    psi = jax.nn.sigmoid(jnp.einsum("nijf,fo->nijo", a, p["wpsi"]) + p["bpsi"][0])
    cat = jnp.concatenate([x2, x2 * psi], axis=-1)   # torch cat([x2, attn(x1)], dim=1)

    def conv(xin, w9, b):
        n, h, w_, cin = xin.shape
        xp = jnp.pad(xin, ((0, 0), (1, 1), (1, 1), (0, 0)))
        acc = jnp.zeros((n, h, w_, w9.shape[-1]), jnp.float32) + b[0]
        for ky in range(3):
            for kx in range(3):
                acc = acc + jnp.einsum("nhwc,co->nhwo",
                                       xp[:, ky:ky + h, kx:kx + w_, :],
                                       w9[ky * 3 + kx])
        return jnp.maximum(acc, 0.0)

    return conv(conv(cat, p["w1"], p["b1"]), p["w2"], p["b2"])


# --------------------------- main --------------------------------------------

if __name__ == "__main__":
    in_channels, out_channels = 8, 4
    N, Hin, Win = 2, 8, 8
    C = in_channels // 2
    H, W = 2 * Hin, 2 * Win

    key = jax.random.PRNGKey(0)
    k1, k2, kp = jax.random.split(key, 3)
    x1_low = jax.random.normal(k1, (N, Hin, Win, C), jnp.float32)   # NHWC
    x2 = jax.random.normal(k2, (N, H, W, C), jnp.float32)           # NHWC
    params = make_params(kp, in_channels, out_channels)
    fp = fold_params(params, N, Hin, Win, H, W)                     # done once, off hot path

    out = up_forward(x1_low, x2, fp, cout=out_channels)
    out = jax.block_until_ready(out)

    ref = _ref_forward(x1_low, x2, params)
    assert out.shape == (N, H, W, out_channels)
    assert jnp.all(jnp.isfinite(out))
    assert jnp.allclose(out, ref, atol=3e-3, rtol=3e-3)

    print("KERNEL_OK")
</pallas_src>

<mosaic_0001>
module attributes {stable_mosaic.version = 11 : i64} {
  func.func @_up_fused_kernel(%arg0: memref<16x32xf32, #tpu.memory_space<vmem>>, %arg1: memref<32x64xf32, #tpu.memory_space<vmem>>, %arg2: memref<32x16xf32, #tpu.memory_space<vmem>>, %arg3: memref<32x32xf32, #tpu.memory_space<vmem>>, %arg4: memref<64x32xf32, #tpu.memory_space<vmem>>, %arg5: memref<1x32xf32, #tpu.memory_space<vmem>>, %arg6: memref<32x16xf32, #tpu.memory_space<vmem>>, %arg7: memref<1x16xf32, #tpu.memory_space<vmem>>, %arg8: memref<16x64xf32, #tpu.memory_space<vmem>>, %arg9: memref<2x32x32xf32, #tpu.memory_space<vmem>>, %arg10: memref<3x64x64xf32, #tpu.memory_space<vmem>>, %arg11: memref<3x64x64xf32, #tpu.memory_space<vmem>>, %arg12: memref<1x64xf32, #tpu.memory_space<vmem>>, %arg13: memref<3x64x128xf32, #tpu.memory_space<vmem>>, %arg14: memref<1x128xf32, #tpu.memory_space<vmem>>, %arg15: memref<32x128xf32, #tpu.memory_space<vmem>>) attributes {dimension_semantics = [], scalar_prefetch = 0 : i64, scratch_operands = 0 : i64, tpu.core_type = #tpu.core_type<tc>} {
    %c0 = arith.constant 0 : index
    %c0_0 = arith.constant 0 : index
    %0 = vector.load %arg0[%c0, %c0_0] : memref<16x32xf32, #tpu.memory_space<vmem>>, vector<16x32xf32>
    %c0_1 = arith.constant 0 : index
    %c0_2 = arith.constant 0 : index
    %1 = vector.load %arg1[%c0_1, %c0_2] : memref<32x64xf32, #tpu.memory_space<vmem>>, vector<32x64xf32>
    %c0_3 = arith.constant 0 : index
    %c0_4 = arith.constant 0 : index
    %2 = vector.load %arg2[%c0_3, %c0_4] : memref<32x16xf32, #tpu.memory_space<vmem>>, vector<32x16xf32>
    %cst = arith.constant dense<0.000000e+00> : vector<32x32xf32>
    %3 = tpu.matmul %2, %0, %cst {dimension_numbers = #tpu.dot_dimension_numbers<[1], [0], [0], [1], [0, 0, 1, 1], [], []>} : vector<32x16xf32>, vector<16x32xf32>, vector<32x32xf32> -> vector<32x32xf32>
    %c0_5 = arith.constant 0 : index
    %c0_6 = arith.constant 0 : index
    %4 = vector.load %arg3[%c0_5, %c0_6] : memref<32x32xf32, #tpu.memory_space<vmem>>, vector<32x32xf32>
    %cst_7 = arith.constant dense<0.000000e+00> : vector<32x32xf32>
    %5 = tpu.matmul %3, %4, %cst_7 {dimension_numbers = #tpu.dot_dimension_numbers<[1], [0], [0], [1], [0, 0, 1, 1], [], []>} : vector<32x32xf32>, vector<32x32xf32>, vector<32x32xf32> -> vector<32x32xf32>
    %c0_8 = arith.constant 0 : index
    %c0_9 = arith.constant 0 : index
    %6 = vector.load %arg4[%c0_8, %c0_9] : memref<64x32xf32, #tpu.memory_space<vmem>>, vector<64x32xf32>
    %cst_10 = arith.constant dense<0.000000e+00> : vector<32x32xf32>
    %7 = tpu.matmul %1, %6, %cst_10 {dimension_numbers = #tpu.dot_dimension_numbers<[1], [0], [0], [1], [0, 0, 1, 1], [], []>} : vector<32x64xf32>, vector<64x32xf32>, vector<32x32xf32> -> vector<32x32xf32>
    %8 = arith.addf %5, %7 : vector<32x32xf32>
    %c0_11 = arith.constant 0 : index
    %c0_12 = arith.constant 0 : index
    %9 = vector.load %arg5[%c0_11, %c0_12] : memref<1x32xf32, #tpu.memory_space<vmem>>, vector<1x32xf32>
    %10 = vector.broadcast %9 : vector<1x32xf32> to vector<32x32xf32>
    %11 = arith.addf %8, %10 : vector<32x32xf32>
    %cst_13 = arith.constant 0.000000e+00 : f32
    %12 = vector.broadcast %cst_13 : f32 to vector<32x32xf32>
    %13 = arith.maximumf %11, %12 : vector<32x32xf32>
    %c0_14 = arith.constant 0 : index
    %c0_15 = arith.constant 0 : index
    %14 = vector.load %arg6[%c0_14, %c0_15] : memref<32x16xf32, #tpu.memory_space<vmem>>, vector<32x16xf32>
    %cst_16 = arith.constant dense<0.000000e+00> : vector<32x16xf32>
    %15 = tpu.matmul %13, %14, %cst_16 {dimension_numbers = #tpu.dot_dimension_numbers<[1], [0], [0], [1], [0, 0, 1, 1], [], []>} : vector<32x32xf32>, vector<32x16xf32>, vector<32x16xf32> -> vector<32x16xf32>
    %c0_17 = arith.constant 0 : index
    %c0_18 = arith.constant 0 : index
    %16 = vector.load %arg7[%c0_17, %c0_18] : memref<1x16xf32, #tpu.memory_space<vmem>>, vector<1x16xf32>
    %17 = vector.broadcast %16 : vector<1x16xf32> to vector<32x16xf32>
    %18 = arith.addf %15, %17 : vector<32x16xf32>
    %19 = arith.negf %18 : vector<32x16xf32>
    %20 = math.exp %19 : vector<32x16xf32>
    %cst_19 = arith.constant 1.000000e+00 : f32
    %21 = vector.broadcast %cst_19 : f32 to vector<32x16xf32>
    %22 = arith.addf %21, %20 : vector<32x16xf32>
    %23 = arith.divf %21, %22 : vector<32x16xf32>
    %c0_20 = arith.constant 0 : index
    %c0_21 = arith.constant 0 : index
    %24 = vector.load %arg8[%c0_20, %c0_21] : memref<16x64xf32, #tpu.memory_space<vmem>>, vector<16x64xf32>
    %cst_22 = arith.constant dense<0.000000e+00> : vector<32x64xf32>
    %25 = tpu.matmul %23, %24, %cst_22 {dimension_numbers = #tpu.dot_dimension_numbers<[1], [0], [0], [1], [0, 0, 1, 1], [], []>} : vector<32x16xf32>, vector<16x64xf32>, vector<32x64xf32> -> vector<32x64xf32>
    %26 = arith.mulf %1, %25 : vector<32x64xf32>
    %c0_23 = arith.constant 0 : index
    %c0_24 = arith.constant 0 : index
    %c0_25 = arith.constant 0 : index
    %27 = vector.load %arg9[%c0_23, %c0_24, %c0_25] : memref<2x32x32xf32, #tpu.memory_space<vmem>>, vector<1x32x32xf32>
    %28 = vector.shape_cast %27 : vector<1x32x32xf32> to vector<32x32xf32>
    %c1 = arith.constant 1 : index
    %c0_26 = arith.constant 0 : index
    %c0_27 = arith.constant 0 : index
    %29 = vector.load %arg9[%c1, %c0_26, %c0_27] : memref<2x32x32xf32, #tpu.memory_space<vmem>>, vector<1x32x32xf32>
    %30 = vector.shape_cast %29 : vector<1x32x32xf32> to vector<32x32xf32>
    %c1_28 = arith.constant 1 : index
    %c0_29 = arith.constant 0 : index
    %c0_30 = arith.constant 0 : index
    %31 = vector.load %arg10[%c1_28, %c0_29, %c0_30] : memref<3x64x64xf32, #tpu.memory_space<vmem>>, vector<1x64x64xf32>
    %32 = vector.shape_cast %31 : vector<1x64x64xf32> to vector<64x64xf32>
    %cst_31 = arith.constant dense<0.000000e+00> : vector<32x64xf32>
    %33 = tpu.matmul %1, %32, %cst_31 {dimension_numbers = #tpu.dot_dimension_numbers<[1], [0], [0], [1], [0, 0, 1, 1], [], []>} : vector<32x64xf32>, vector<64x64xf32>, vector<32x64xf32> -> vector<32x64xf32>
    %c1_32 = arith.constant 1 : index
    %c0_33 = arith.constant 0 : index
    %c0_34 = arith.constant 0 : index
    %34 = vector.load %arg11[%c1_32, %c0_33, %c0_34] : memref<3x64x64xf32, #tpu.memory_space<vmem>>, vector<1x64x64xf32>
    %35 = vector.shape_cast %34 : vector<1x64x64xf32> to vector<64x64xf32>
    %cst_35 = arith.constant dense<0.000000e+00> : vector<32x64xf32>
    %36 = tpu.matmul %26, %35, %cst_35 {dimension_numbers = #tpu.dot_dimension_numbers<[1], [0], [0], [1], [0, 0, 1, 1], [], []>} : vector<32x64xf32>, vector<64x64xf32>, vector<32x64xf32> -> vector<32x64xf32>
    %37 = arith.addf %33, %36 : vector<32x64xf32>
    %c0_36 = arith.constant 0 : index
    %c0_37 = arith.constant 0 : index
    %c0_38 = arith.constant 0 : index
    %38 = vector.load %arg10[%c0_36, %c0_37, %c0_38] : memref<3x64x64xf32, #tpu.memory_space<vmem>>, vector<1x64x64xf32>
    %39 = vector.shape_cast %38 : vector<1x64x64xf32> to vector<64x64xf32>
    %cst_39 = arith.constant dense<0.000000e+00> : vector<32x64xf32>
    %40 = tpu.matmul %1, %39, %cst_39 {dimension_numbers = #tpu.dot_dimension_numbers<[1], [0], [0], [1], [0, 0, 1, 1], [], []>} : vector<32x64xf32>, vector<64x64xf32>, vector<32x64xf32> -> vector<32x64xf32>
    %c0_40 = arith.constant 0 : index
    %c0_41 = arith.constant 0 : index
    %c0_42 = arith.constant 0 : index
    %41 = vector.load %arg11[%c0_40, %c0_41, %c0_42] : memref<3x64x64xf32, #tpu.memory_space<vmem>>, vector<1x64x64xf32>
    %42 = vector.shape_cast %41 : vector<1x64x64xf32> to vector<64x64xf32>
    %cst_43 = arith.constant dense<0.000000e+00> : vector<32x64xf32>
    %43 = tpu.matmul %26, %42, %cst_43 {dimension_numbers = #tpu.dot_dimension_numbers<[1], [0], [0], [1], [0, 0, 1, 1], [], []>} : vector<32x64xf32>, vector<64x64xf32>, vector<32x64xf32> -> vector<32x64xf32>
    %44 = arith.addf %40, %43 : vector<32x64xf32>
    %cst_44 = arith.constant dense<0.000000e+00> : vector<32x64xf32>
    %45 = tpu.matmul %28, %44, %cst_44 {dimension_numbers = #tpu.dot_dimension_numbers<[1], [0], [0], [1], [0, 0, 1, 1], [], []>} : vector<32x32xf32>, vector<32x64xf32>, vector<32x64xf32> -> vector<32x64xf32>
    %46 = arith.addf %37, %45 : vector<32x64xf32>
    %c2 = arith.constant 2 : index
    %c0_45 = arith.constant 0 : index
    %c0_46 = arith.constant 0 : index
    %47 = vector.load %arg10[%c2, %c0_45, %c0_46] : memref<3x64x64xf32, #tpu.memory_space<vmem>>, vector<1x64x64xf32>
    %48 = vector.shape_cast %47 : vector<1x64x64xf32> to vector<64x64xf32>
    %cst_47 = arith.constant dense<0.000000e+00> : vector<32x64xf32>
    %49 = tpu.matmul %1, %48, %cst_47 {dimension_numbers = #tpu.dot_dimension_numbers<[1], [0], [0], [1], [0, 0, 1, 1], [], []>} : vector<32x64xf32>, vector<64x64xf32>, vector<32x64xf32> -> vector<32x64xf32>
    %c2_48 = arith.constant 2 : index
    %c0_49 = arith.constant 0 : index
    %c0_50 = arith.constant 0 : index
    %50 = vector.load %arg11[%c2_48, %c0_49, %c0_50] : memref<3x64x64xf32, #tpu.memory_space<vmem>>, vector<1x64x64xf32>
    %51 = vector.shape_cast %50 : vector<1x64x64xf32> to vector<64x64xf32>
    %cst_51 = arith.constant dense<0.000000e+00> : vector<32x64xf32>
    %52 = tpu.matmul %26, %51, %cst_51 {dimension_numbers = #tpu.dot_dimension_numbers<[1], [0], [0], [1], [0, 0, 1, 1], [], []>} : vector<32x64xf32>, vector<64x64xf32>, vector<32x64xf32> -> vector<32x64xf32>
    %53 = arith.addf %49, %52 : vector<32x64xf32>
    %cst_52 = arith.constant dense<0.000000e+00> : vector<32x64xf32>
    %54 = tpu.matmul %30, %53, %cst_52 {dimension_numbers = #tpu.dot_dimension_numbers<[1], [0], [0], [1], [0, 0, 1, 1], [], []>} : vector<32x32xf32>, vector<32x64xf32>, vector<32x64xf32> -> vector<32x64xf32>
    %55 = arith.addf %46, %54 : vector<32x64xf32>
    %c0_53 = arith.constant 0 : index
    %c0_54 = arith.constant 0 : index
    %56 = vector.load %arg12[%c0_53, %c0_54] : memref<1x64xf32, #tpu.memory_space<vmem>>, vector<1x64xf32>
    %57 = vector.broadcast %56 : vector<1x64xf32> to vector<32x64xf32>
    %58 = arith.addf %55, %57 : vector<32x64xf32>
    %cst_55 = arith.constant 0.000000e+00 : f32
    %59 = vector.broadcast %cst_55 : f32 to vector<32x64xf32>
    %60 = arith.maximumf %58, %59 : vector<32x64xf32>
    %c1_56 = arith.constant 1 : index
    %c0_57 = arith.constant 0 : index
    %c0_58 = arith.constant 0 : index
    %61 = vector.load %arg13[%c1_56, %c0_57, %c0_58] : memref<3x64x128xf32, #tpu.memory_space<vmem>>, vector<1x64x128xf32>
    %62 = vector.shape_cast %61 : vector<1x64x128xf32> to vector<64x128xf32>
    %cst_59 = arith.constant dense<0.000000e+00> : vector<32x128xf32>
    %63 = tpu.matmul %60, %62, %cst_59 {dimension_numbers = #tpu.dot_dimension_numbers<[1], [0], [0], [1], [0, 0, 1, 1], [], []>} : vector<32x64xf32>, vector<64x128xf32>, vector<32x128xf32> -> vector<32x128xf32>
    %c0_60 = arith.constant 0 : index
    %c0_61 = arith.constant 0 : index
    %c0_62 = arith.constant 0 : index
    %64 = vector.load %arg13[%c0_60, %c0_61, %c0_62] : memref<3x64x128xf32, #tpu.memory_space<vmem>>, vector<1x64x128xf32>
    %65 = vector.shape_cast %64 : vector<1x64x128xf32> to vector<64x128xf32>
    %cst_63 = arith.constant dense<0.000000e+00> : vector<32x128xf32>
    %66 = tpu.matmul %60, %65, %cst_63 {dimension_numbers = #tpu.dot_dimension_numbers<[1], [0], [0], [1], [0, 0, 1, 1], [], []>} : vector<32x64xf32>, vector<64x128xf32>, vector<32x128xf32> -> vector<32x128xf32>
    %cst_64 = arith.constant dense<0.000000e+00> : vector<32x128xf32>
    %67 = tpu.matmul %28, %66, %cst_64 {dimension_numbers = #tpu.dot_dimension_numbers<[1], [0], [0], [1], [0, 0, 1, 1], [], []>} : vector<32x32xf32>, vector<32x128xf32>, vector<32x128xf32> -> vector<32x128xf32>
    %68 = arith.addf %63, %67 : vector<32x128xf32>
    %c2_65 = arith.constant 2 : index
    %c0_66 = arith.constant 0 : index
    %c0_67 = arith.constant 0 : index
    %69 = vector.load %arg13[%c2_65, %c0_66, %c0_67] : memref<3x64x128xf32, #tpu.memory_space<vmem>>, vector<1x64x128xf32>
    %70 = vector.shape_cast %69 : vector<1x64x128xf32> to vector<64x128xf32>
    %cst_68 = arith.constant dense<0.000000e+00> : vector<32x128xf32>
    %71 = tpu.matmul %60, %70, %cst_68 {dimension_numbers = #tpu.dot_dimension_numbers<[1], [0], [0], [1], [0, 0, 1, 1], [], []>} : vector<32x64xf32>, vector<64x128xf32>, vector<32x128xf32> -> vector<32x128xf32>
    %cst_69 = arith.constant dense<0.000000e+00> : vector<32x128xf32>
    %72 = tpu.matmul %30, %71, %cst_69 {dimension_numbers = #tpu.dot_dimension_numbers<[1], [0], [0], [1], [0, 0, 1, 1], [], []>} : vector<32x32xf32>, vector<32x128xf32>, vector<32x128xf32> -> vector<32x128xf32>
    %73 = arith.addf %68, %72 : vector<32x128xf32>
    %c0_70 = arith.constant 0 : index
    %c0_71 = arith.constant 0 : index
    %74 = vector.load %arg14[%c0_70, %c0_71] : memref<1x128xf32, #tpu.memory_space<vmem>>, vector<1x128xf32>
    %75 = vector.broadcast %74 : vector<1x128xf32> to vector<32x128xf32>
    %76 = arith.addf %73, %75 : vector<32x128xf32>
    %cst_72 = arith.constant 0.000000e+00 : f32
    %77 = vector.broadcast %cst_72 : f32 to vector<32x128xf32>
    %78 = arith.maximumf %76, %77 : vector<32x128xf32>
    %c0_73 = arith.constant 0 : index
    %c0_74 = arith.constant 0 : index
    %79 = vector.load %arg15[%c0_73, %c0_74] : memref<32x128xf32, #tpu.memory_space<vmem>>, vector<32x128xf32>
    tpu.vector_store %arg15[%c0_73, %c0_74], %78 {strides = array<i32>} : memref<32x128xf32, #tpu.memory_space<vmem>>, vector<32x128xf32>,
    return
  }
}

</mosaic_0001>

<bundles_post_ra>
// kernel: up_forward.1
= control target key start
LH: loop header
LB: loop body
LE: loop exit
PB: predicated region body
PF: predicated region fallthrough
CT: control target
= control target key end

     0   :  { %vm60_vm0 = vcmask 130048   ;;  %vm114_vm1 = vcmask 523264   ;;  %vm156_vm2 = vcmask 261120   ;;  %s1694_s0 = inlined_call_operand.vmem [shape: f32[16,32], index: 0, kind: input, shape index: {}]   ;;  %s1695_s2 = inlined_call_operand.vmem [shape: f32[32,16], index: 2, kind: input, shape index: {}]   ;;  %s1696_s4 = inlined_call_operand.vmem [shape: f32[64,32], index: 4, kind: input, shape index: {}]   ;;  %s1697_s3 = inlined_call_operand.vmem [shape: f32[32,32], index: 3, kind: input, shape index: {}]   ;;  %s1698_s1 = inlined_call_operand.vmem [shape: f32[32,64], index: 1, kind: input, shape index: {}]   ;;  %s1699_s5 = inlined_call_operand.vmem [shape: f32[1,32], index: 5, kind: input, shape index: {}]   ;;  %s1700_s7 = inlined_call_operand.vmem [shape: f32[1,16], index: 7, kind: input, shape index: {}]   ;;  %s1701_s6 = inlined_call_operand.vmem [shape: f32[32,16], index: 6, kind: input, shape index: {}]   ;;  %s1702_s8 = inlined_call_operand.vmem [shape: f32[16,64], index: 8, kind: input, shape index: {}]   ;;  %s1703_s10 = inlined_call_operand.vmem [shape: f32[3,64,64], index: 10, kind: input, shape index: {}]   ;;  %s1704_s11 = inlined_call_operand.vmem [shape: f32[3,64,64], index: 11, kind: input, shape index: {}]   ;;  %s1705_s9 = inlined_call_operand.vmem [shape: f32[2,32,32], index: 9, kind: input, shape index: {}]   ;;  %s1706_s12 = inlined_call_operand.vmem [shape: f32[1,64], index: 12, kind: input, shape index: {}]   ;;  %s1707_s13 = inlined_call_operand.vmem [shape: f32[3,64,128], index: 13, kind: input, shape index: {}]   ;;  %s1708_s14 = inlined_call_operand.vmem [shape: f32[1,128], index: 14, kind: input, shape index: {}]   ;;  %s1709_s15 = inlined_call_operand.vmem [shape: f32[32,128], index: 15, kind: output, shape index: {}]  }
   0x1   :  { %v51_v0 = vld [vmem:[%s1694_s0 + $0x8] sm:$0xff]  ;;  %v50_v1 = vld [vmem:[%s1694_s0] sm:$0xff]  ;;  %v58_v3 = vld [vmem:[%s1695_s2 + $0x10] sm:$0xff] }
   0x2   :  { %87 = vmatpush.msra.mxu0 %v51_v0  ;;  %v56_v2 = vld [vmem:[%s1695_s2] sm:$0xff]  ;;  %1066 = vmatpush.msra.mxu1 %v51_v0  ;;  %v113_v4 = vld [vmem:[%s1696_s4 + $0x38] sm:$0xff]  ;;  %v112_v6 = vld [vmem:[%s1696_s4 + $0x30] sm:$0xff] }
   0x3   :  { %v105_v5 = vld [vmem:[%s1697_s3 + $0x18] sm:$0xff]  ;;  %v104_v7 = vld [vmem:[%s1697_s3 + $0x10] sm:$0xff]  ;;  %v111_v8 = vld [vmem:[%s1696_s4 + $0x28] sm:$0xff] }
   0x4   :  { %88 = vmatpush.msra.mxu0 %v50_v1  ;;  %1067 = vmatpush.msra.mxu1 %v50_v1  ;;  %v103_v9 = vld [vmem:[%s1697_s3 + $0x8] sm:$0xff]  ;;  %v110_v10 = vld [vmem:[%s1696_s4 + $0x20] sm:$0xff]  ;;  %v59_v12 = vld [vmem:[%s1695_s2 + $0x18] sm:$0xff] }
   0x5   :  { %938 = vmatmul.msk.f32.vlgmr.msra.gmra.mxu0 %vm60_vm0, %v56_v2  ;;  %940 = vmatmul.msk.f32.vlgmr.msra.gmra.mxu1 %vm60_vm0, %v58_v3  ;;  %v57_v11 = vld [vmem:[%s1695_s2 + $0x8] sm:$0xff]  ;;  %v109_v13 = vld [vmem:[%s1696_s4 + $0x18] sm:$0xff]  ;;  %v102_v14 = vld [vmem:[%s1697_s3] sm:$0xff] }
   0x6   :  { %135 = vmatpush.msrb.mxu1 %v113_v4  ;;  %181 = vmatpush.msra.mxu2 %v105_v5  ;;  %v108_v15 = vld [vmem:[%s1696_s4 + $0x10] sm:$0xff]  ;;  %v107_v16 = vld [vmem:[%s1696_s4 + $0x8] sm:$0xff]  ;;  %v106_v17 = vld [vmem:[%s1696_s4] sm:$0xff] }
   0x7   :  { %1068 = vmatpush.msra.mxu3 %v105_v5  ;;  %v1233_v18 = vld [vmem:[%s1698_s1] sm:$0xff]  ;;  %v1240_v19 = vld [vmem:[%s1698_s1 + $0x8] sm:$0xff]  ;;  %v1247_v20 = vld [vmem:[%s1698_s1 + $0x10] sm:$0xff] }
   0x8   :  { %136 = vmatpush.msrb.mxu1 %v112_v6  ;;  %182 = vmatpush.msra.mxu2 %v104_v7  ;;  %v1254_v21 = vld [vmem:[%s1698_s1 + $0x18] sm:$0xff]  ;;  %v212_v27 = vld [vmem:[%s1701_s6 + $0x10] sm:$0xff]  ;;  %v211_v28 = vld [vmem:[%s1701_s6 + $0x8] sm:$0xff] }
   0x9   :  { %1069 = vmatpush.msra.mxu3 %v104_v7  ;;  %v213_v26 = vld [vmem:[%s1701_s6 + $0x18] sm:$0xff]  ;;  %v210_v29 = vld [vmem:[%s1701_s6] sm:$0xff]  ;;  %v336_v51 = vld [vmem:[%s1702_s8 + $0x8] sm:$0xff] }
   0xa   :  { %137 = vmatpush.msrb.mxu1 %v111_v8  ;;  %183 = vmatpush.msra.mxu2 %v103_v9  ;;  %v1072_v32 = vld [vmem:[%s1699_s5] ss:$0 sm:$0xff]  ;;  %v973_v6 = vld [vmem:[%s1703_s10 + $0x78] sm:$0xff]  ;;  %v972_v7 = vld [vmem:[%s1703_s10 + $0x70] sm:$0xff] }
   0xb   :  { %1070 = vmatpush.msra.mxu3 %v103_v9  ;;  %363 = vmatpush.msrb.mxu0 %v336_v51  ;;  %v1073_v52 = vld [vmem:[%s1700_s7] ss:$0 sm:$0xff]  ;;  %v976_v51 = vld [vmem:[%s1704_s11 + $0x50] sm:$0xff] }
   0xc   :  { %138 = vmatpush.msrb.mxu1 %v110_v10  ;;  %184 = vmatpush.msra.mxu2 %v102_v14  ;;  %v335_v53 = vld [vmem:[%s1702_s8] sm:$0xff] }
   0xd   :  { %939 = vmatmul.msk.f32.gmra.mxu0 %vm60_vm0, %v57_v11  ;;  %941 = vmatmul.msk.f32.gmra.mxu1 %vm60_vm0, %v59_v12 }
   0xe   :  { %139 = vmatpush.msrb.mxu1 %v109_v13  ;;  %1071 = vmatpush.msra.mxu3 %v102_v14  ;;  %v971_v13 = vld [vmem:[%s1703_s10 + $0x68] sm:$0xff]  ;;  %v981_v14 = vld [vmem:[%s1704_s11 + $0x78] sm:$0xff] }
   0xf   :  { %364 = vmatpush.msrb.mxu0 %v335_v53  ;;  %429 = vmatpush.msrb.mxu2 %v981_v14 }
  0x10   :  { %140 = vmatpush.msrb.mxu1 %v108_v15  ;;  %242 = vmatpush.msrb.mxu3 %v213_v26  ;;  %v970_v15 = vld [vmem:[%s1703_s10 + $0x60] sm:$0xff]  ;;  %v493_v26 = vld [vmem:[%s1704_s11 + $0x30] sm:$0xff] }
  0x12   :  { %141 = vmatpush.msrb.mxu1 %v107_v16  ;;  %243 = vmatpush.msrb.mxu3 %v212_v27  ;;  %v494_v16 = vld [vmem:[%s1704_s11 + $0x38] sm:$0xff]  ;;  %v485_v27 = vld [vmem:[%s1703_s10 + $0x30] sm:$0xff] }
  0x14   :  { %142 = vmatpush.msrb.mxu1 %v106_v17  ;;  %244 = vmatpush.msrb.mxu3 %v211_v28  ;;  %v486_v17 = vld [vmem:[%s1703_s10 + $0x38] sm:$0xff] }
  0x15   :  { %942 = vmatmul.msk.f32.vlgmr.msrb.gmra.mxu1 %vm114_vm1, %v1233_v18  ;;  %532 = vmatpush.msra.mxu0 %v486_v17 }
  0x16   :  { %245 = vmatpush.msrb.mxu3 %v210_v29  ;;  %503 = vmatpush.msra.mxu1 %v494_v16 }
  0x17   :  { %533 = vmatpush.msra.mxu0 %v485_v27  ;;  %v975_v27 = vld [vmem:[%s1704_s11 + $0x48] sm:$0xff] }
  0x18   :  { %504 = vmatpush.msra.mxu1 %v493_v26 }
  0x1d   :  { %943 = vmatmul.msk.f32.gmra.mxu1 %vm114_vm1, %v1240_v19 }
  0x25   :  { %944 = vmatmul.msk.f32.gmra.mxu1 %vm114_vm1, %v1247_v20 }
  0x2d   :  { %945 = vmatmul.msk.f32.gmra.mxu1 %vm114_vm1, %v1254_v21 }
  0x82   :  { %v90_v22 = vpop.f32.mrf.mxu0  ;;  %v96_v23 = vpop.f32.mrf.mxu1 }
  0x83   :  { %946 = vmatmul.msk.f32.vlgmr.msra.gmra.mxu2 %vm156_vm2, %v90_v22  ;;  %948 = vmatmul.msk.f32.vlgmr.msra.gmra.mxu3 %vm156_vm2, %v96_v23 }
  0x84   :  { %458 = vmatpush.msra.mxu3 %v973_v6 }
  0x86   :  { %459 = vmatpush.msra.mxu3 %v972_v7  ;;  %v1014_v7 = vld [vmem:[%s1704_s11 + $0xa0] sm:$0xff] }
  0x88   :  { %460 = vmatpush.msra.mxu3 %v971_v13 }
  0x8a   :  { %v93_v24 = vpop.f32.mrf.mxu0  ;;  %v99_v25 = vpop.f32.mrf.mxu1  ;;  %461 = vmatpush.msra.mxu3 %v970_v15  ;;  %v1012_v15 = vld [vmem:[%s1704_s11 + $0x90] sm:$0xff] }
  0x8b   :  { %947 = vmatmul.msk.f32.gmra.mxu2 %vm156_vm2, %v93_v24  ;;  %949 = vmatmul.msk.f32.gmra.mxu3 %vm156_vm2, %v99_v25  ;;  %v980_v25 = vld [vmem:[%s1704_s11 + $0x70] sm:$0xff] }
  0x8c   :  { %430 = vmatpush.msrb.mxu2 %v980_v25 }
  0x92   :  { %v144_v30 = vpop.f32.mrf.mxu1 }
  0x9a   :  { %v147_v31 = vpop.f32.mrf.mxu1 }
  0xa2   :  { %v150_v37 = vpop.f32.mrf.mxu1 }
  0xaa   :  { %v153_v45 = vpop.f32.mrf.mxu1 }
 0x106   :  { %v186_v33 = vpop.f32.mrf.mxu2  ;;  %v192_v38 = vpop.f32.mrf.mxu3 }
 0x107   :  { %v187_v34 = vadd.f32 %v186_v33, %v144_v30  ;;  %v193_v42 = vadd.f32 %v192_v38, %v150_v37  ;;  %v492_v33 = vld [vmem:[%s1704_s11 + $0x28] sm:$0xff] }
 0x108   :  { %v484_v37 = vld [vmem:[%s1703_s10 + $0x28] sm:$0xff]  ;;  %505 = vmatpush.msra.mxu1 %v492_v33  ;;  %v479_v33 = vld [vmem:[%s1703_s10] sm:$0xff] }
 0x109   :  { %v202_v35 = vadd.f32 %v1072_v32, %v187_v34  ;;  %v204_v44 = vadd.f32 %v1072_v32, %v193_v42  ;;  %v968_v42 = vld [vmem:[%s1703_s10 + $0x50] sm:$0xff]  ;;  %534 = vmatpush.msra.mxu0 %v484_v37  ;;  %v1011_v30 = vld [vmem:[%s1704_s11 + $0x88] sm:$0xff] }
 0x10a   :  { %v1007_v37 = vld [vmem:[%s1703_s10 + $0xa8] sm:$0xff] }
 0x10b   :  { %v206_v36 = vmax.f32 %v202_v35, 0.0  ;;  %v208_v47 = vmax.f32 %v204_v44, 0.0 }
 0x10d   :  { %950 = vmatmul.msk.f32.vlgmr.msrb.gmra.mxu3 %vm156_vm2, %v206_v36  ;;  %v969_v36 = vld [vmem:[%s1703_s10 + $0x58] sm:$0xff] }
 0x10e   :  { %v189_v39 = vpop.f32.mrf.mxu2  ;;  %v195_v46 = vpop.f32.mrf.mxu3  ;;  %462 = vmatpush.msra.mxu3 %v969_v36  ;;  %v1008_v36 = vld [vmem:[%s1703_s10 + $0xb0] sm:$0xff] }
 0x10f   :  { %v190_v40 = vadd.f32 %v189_v39, %v147_v31  ;;  %v196_v48 = vadd.f32 %v195_v46, %v153_v45  ;;  %v978_v39 = vld [vmem:[%s1704_s11 + $0x60] sm:$0xff]  ;;  %v977_v45 = vld [vmem:[%s1704_s11 + $0x58] sm:$0xff] }
 0x110   :  { %v490_v46 = vld [vmem:[%s1704_s11 + $0x18] sm:$0xff]  ;;  %463 = vmatpush.msra.mxu3 %v968_v42 }
 0x111   :  { %v203_v41 = vadd.f32 %v1072_v32, %v190_v40  ;;  %v205_v49 = vadd.f32 %v1072_v32, %v196_v48  ;;  %v979_v32 = vld [vmem:[%s1704_s11 + $0x68] sm:$0xff]  ;;  %v491_v40 = vld [vmem:[%s1704_s11 + $0x20] sm:$0xff] }
 0x112   :  { %431 = vmatpush.msrb.mxu2 %v979_v32  ;;  %506 = vmatpush.msra.mxu1 %v491_v40  ;;  %v487_v32 = vld [vmem:[%s1704_s11] sm:$0xff]  ;;  %v1004_v40 = vld [vmem:[%s1703_s10 + $0x90] sm:$0xff] }
 0x113   :  { %v207_v43 = vmax.f32 %v203_v41, 0.0  ;;  %v209_v50 = vmax.f32 %v205_v49, 0.0  ;;  %v967_v49 = vld [vmem:[%s1703_s10 + $0x48] sm:$0xff] }
 0x114   :  { %432 = vmatpush.msrb.mxu2 %v978_v39  ;;  %507 = vmatpush.msra.mxu1 %v490_v46  ;;  %v1005_v39 = vld [vmem:[%s1703_s10 + $0x98] sm:$0xff] }
 0x115   :  { %951 = vmatmul.msk.f32.gmra.mxu3 %vm156_vm2, %v207_v43  ;;  %v483_v43 = vld [vmem:[%s1703_s10 + $0x20] sm:$0xff] }
 0x116   :  { %535 = vmatpush.msra.mxu0 %v483_v43  ;;  %433 = vmatpush.msrb.mxu2 %v977_v45 }
 0x117   :  { %464 = vmatpush.msra.mxu3 %v967_v49 }
 0x118   :  { %434 = vmatpush.msrb.mxu2 %v976_v51 }
 0x11a   :  { %435 = vmatpush.msrb.mxu2 %v975_v27  ;;  %v746_v27 = vld [vmem:[%s1707_s13 + $0x30] sm:$0xff] }
 0x11d   :  { %952 = vmatmul.msk.f32.gmra.mxu3 %vm156_vm2, %v208_v47 }
 0x125   :  { %953 = vmatmul.msk.f32.gmra.mxu3 %vm156_vm2, %v209_v50  ;;  %v482_v50 = vld [vmem:[%s1703_s10 + $0x18] sm:$0xff] }
 0x126   :  { %536 = vmatpush.msra.mxu0 %v482_v50 }
 0x190   :  { %v247_v54 = vpop.f32.mrf.mxu3 }
 0x191   :  { %v248_v55 = vadd.f32 %v1073_v52, %v247_v54 }
 0x193   :  { %v954_v56 = vmul.f32 -1.442695, %v248_v55  ;;  %v966_v55 = vld [vmem:[%s1703_s10 + $0x40] sm:$0xff] }
 0x194   :  { %465 = vmatpush.msra.mxu3 %v966_v55 }
 0x195   :  { %1076 = vpow2.f32 %v954_v56  ;;  %v481_v56 = vld [vmem:[%s1703_s10 + $0x10] sm:$0xff]  ;;  %986 = vmatmul.msk.f32.vlgmr.msra.gmra.mxu3 %vm114_vm1, %v1233_v18 }
 0x196   :  { %537 = vmatpush.msra.mxu0 %v481_v56 }
 0x198   :  { %v250_v57 = vpop.f32.mrf.mxu3 }
 0x199   :  { %v251_v58 = vadd.f32 %v1073_v52, %v250_v57 }
 0x19b   :  { %v1077_v59 = vpop.eup %1076  ;;  %v955_v60 = vmul.f32 -1.442695, %v251_v58 }
 0x19c   :  { %v271_v61 = vadd.f32 1.0, %v1077_v59 }
 0x19d   :  { %1078 = vpow2.f32 %v955_v60  ;;  %987 = vmatmul.msk.f32.gmra.mxu3 %vm114_vm1, %v1240_v19 }
 0x19e   :  { %1080 = vrcp.f32 %v271_v61  ;;  %v286_v9 = vand.u32 2147483648, %v271_v61  ;;  %v284_v12 = vand.u32 2147483647, %v271_v61  ;;  %vm280_vm4 = vweird.f32 %v271_v61 }
 0x1a0   :  { %v253_v62 = vpop.f32.mrf.mxu3  ;;  %v287_v31 = vor.u32 1.1754944e-38, %v286_v9  ;;  %vm285_vm6 = vcmp.eq.f32.partialorder %v284_v12, 8.507059e+37  ;;  %v1013_v12 = vld [vmem:[%s1704_s11 + $0x98] sm:$0xff] }
 0x1a1   :  { %v254_v63 = vadd.f32 %v1073_v52, %v253_v62  ;;  %v1017_v62 = vld [vmem:[%s1704_s11 + $0xb8] sm:$0xff] }
 0x1a2   :  { %624 = vmatpush.msrb.mxu3 %v1017_v62 }
 0x1a3   :  { %v1079_v0 = vpop.eup %1078  ;;  %v956_v1 = vmul.f32 -1.442695, %v254_v63 }
 0x1a4   :  { %v1081_v2 = vpop.eup %1080  ;;  %v1290_v3 = vadd.f32 1.0, %v1079_v0 }
 0x1a5   :  { %1082 = vpow2.f32 %v956_v1  ;;  %v276_v4 = vmul.f32 %v1081_v2, %v271_v61  ;;  %vm281_vm3 = vweird.f32 %v1081_v2  ;;  %v1016_v1 = vld [vmem:[%s1704_s11 + $0xb0] sm:$0xff]  ;;  %988 = vmatmul.msk.f32.gmra.mxu3 %vm114_vm1, %v1247_v20 }
 0x1a6   :  { %1084 = vrcp.f32 %v1290_v3  ;;  %vm1328_vm5 = vmor %vm280_vm4, %vm281_vm3  ;;  %v301_v44 = vand.u32 2147483648, %v1290_v3  ;;  %v299_v48 = vand.u32 2147483647, %v1290_v3  ;;  %vm295_vm8 = vweird.f32 %v1290_v3  ;;  %625 = vmatpush.msrb.mxu3 %v1016_v1 }
 0x1a7   :  { %v277_v5 = vsub.f32 1.0, %v276_v4 }
 0x1a8   :  { %v256_v8 = vpop.f32.mrf.mxu3  ;;  %v302_v59 = vor.u32 1.1754944e-38, %v301_v44  ;;  %vm300_vm10 = vcmp.eq.f32.partialorder %v299_v48, 8.507059e+37  ;;  %v1002_v44 = vld [vmem:[%s1703_s10 + $0x80] sm:$0xff] }
 0x1a9   :  { %v257_v10 = vadd.f32 %v1073_v52, %v256_v8  ;;  %v278_v11 = vmul.f32 %v1081_v2, %v277_v5  ;;  %v489_v52 = vld [vmem:[%s1704_s11 + $0x10] sm:$0xff]  ;;  %v1015_v5 = vld [vmem:[%s1704_s11 + $0xa8] sm:$0xff] }
 0x1aa   :  { %508 = vmatpush.msra.mxu1 %v489_v52  ;;  %626 = vmatpush.msrb.mxu3 %v1015_v5 }
 0x1ab   :  { %v1083_v22 = vpop.eup %1082  ;;  %v957_v23 = vmul.f32 -1.442695, %v257_v10  ;;  %v279_v24 = vadd.f32 %v1081_v2, %v278_v11 }
 0x1ac   :  { %v1323_v28 = vpop.eup %1084  ;;  %v1325_v29 = vadd.f32 1.0, %v1083_v22  ;;  %627 = vmatpush.msrb.mxu3 %v1014_v7 }
 0x1ad   :  { %1086 = vpow2.f32 %v957_v23  ;;  %v283_v34 = vsel %vm1328_vm5, %v1081_v2, %v279_v24  ;;  %v291_v35 = vmul.f32 %v1323_v28, %v1290_v3  ;;  %vm296_vm7 = vweird.f32 %v1323_v28  ;;  %989 = vmatmul.msk.f32.gmra.mxu3 %vm114_vm1, %v1254_v21 }
 0x1ae   :  { %1088 = vrcp.f32 %v1325_v29  ;;  %v288_v38 = vsel %vm285_vm6, %v287_v31, %v283_v34  ;;  %vm297_vm9 = vmor %vm295_vm8, %vm296_vm7  ;;  %v316_v2 = vand.u32 2147483648, %v1325_v29  ;;  %v314_v4 = vand.u32 2147483647, %v1325_v29  ;;  %628 = vmatpush.msrb.mxu3 %v1013_v12  ;;  %v974_v31 = vld [vmem:[%s1704_s11 + $0x40] sm:$0xff] }
 0x1af   :  { %958 = vmatmul.msk.f32.vlgmr.msrb.gmra.mxu0 %vm60_vm0, %v288_v38  ;;  %v292_v41 = vsub.f32 1.0, %v291_v35  ;;  %vm310_vm12 = vweird.f32 %v1325_v29  ;;  %v1010_v34 = vld [vmem:[%s1704_s11 + $0x80] sm:$0xff]  ;;  %436 = vmatpush.msrb.mxu2 %v974_v31  ;;  %v1009_v35 = vld [vmem:[%s1703_s10 + $0xb8] sm:$0xff]  ;;  %v1035_v31 = vld [vmem:[%s1707_s13 + $0x68] sm:$0xff] }
 0x1b0   :  { %v317_v9 = vor.u32 1.1754944e-38, %v316_v2  ;;  %vm315_vm14 = vcmp.eq.f32.partialorder %v314_v4, 8.507059e+37  ;;  %629 = vmatpush.msrb.mxu3 %v1012_v15  ;;  %v1006_v38 = vld [vmem:[%s1703_s10 + $0xa0] sm:$0xff] }
 0x1b1   :  { %v293_v47 = vmul.f32 %v1323_v28, %v292_v41  ;;  %v1003_v41 = vld [vmem:[%s1703_s10 + $0x88] sm:$0xff]  ;;  %v1547_v15 = vld [vmem:[%s1705_s9 + $0x20] sm:$0xff] }
 0x1b2   :  { %630 = vmatpush.msrb.mxu3 %v1011_v30  ;;  %v745_v30 = vld [vmem:[%s1707_s13 + $0x28] sm:$0xff] }
 0x1b3   :  { %v1087_v53 = vpop.eup %1086  ;;  %v294_v54 = vadd.f32 %v1323_v28, %v293_v47 }
 0x1b4   :  { %v1089_v57 = vpop.eup %1088  ;;  %v274_v58 = vadd.f32 1.0, %v1087_v53  ;;  %631 = vmatpush.msrb.mxu3 %v1010_v34  ;;  %v744_v34 = vld [vmem:[%s1707_s13 + $0x20] sm:$0xff] }
 0x1b5   :  { %v298_v60 = vsel %vm297_vm9, %v1323_v28, %v294_v54  ;;  %v306_v61 = vmul.f32 %v1089_v57, %v1325_v29  ;;  %vm311_vm11 = vweird.f32 %v1089_v57  ;;  %v488_v28 = vld [vmem:[%s1704_s11 + $0x8] sm:$0xff] }
 0x1b6   :  { %1090 = vrcp.f32 %v274_v58  ;;  %v303_v63 = vsel %vm300_vm10, %v302_v59, %v298_v60  ;;  %vm312_vm13 = vmor %vm310_vm12, %vm311_vm11  ;;  %v331_v16 = vand.u32 2147483648, %v274_v58  ;;  %v329_v22 = vand.u32 2147483647, %v274_v58  ;;  %v480_v29 = vld [vmem:[%s1703_s10 + $0x8] sm:$0xff]  ;;  %509 = vmatpush.msra.mxu1 %v488_v28  ;;  %v1036_v28 = vld [vmem:[%s1707_s13 + $0x70] sm:$0xff] }
 0x1b7   :  { %959 = vmatmul.msk.f32.gmra.mxu0 %vm60_vm0, %v303_v63  ;;  %v307_v0 = vsub.f32 1.0, %v306_v61  ;;  %vm325_vm3 = vweird.f32 %v274_v58 }
 0x1b8   :  { %v332_v24 = vor.u32 1.1754944e-38, %v331_v16  ;;  %vm330_vm5 = vcmp.eq.f32.partialorder %v329_v22, 8.507059e+37  ;;  %538 = vmatpush.msra.mxu0 %v480_v29  ;;  %510 = vmatpush.msra.mxu1 %v487_v32  ;;  %v1554_v16 = vld [vmem:[%s1705_s9 + $0x28] sm:$0xff]  ;;  %v1568_v22 = vld [vmem:[%s1705_s9 + $0x38] sm:$0xff]  ;;  %v1056_v29 = vld [vmem:[%s1707_s13 + $0xb0] sm:$0xff] }
 0x1b9   :  { %v308_v3 = vmul.f32 %v1089_v57, %v307_v0  ;;  %v1519_v0 = vld [vmem:[%s1705_s9] sm:$0xff] }
 0x1ba   :  { %539 = vmatpush.msra.mxu0 %v479_v33  ;;  %653 = vmatpush.msrb.mxu1 %v1009_v35  ;;  %v1055_v33 = vld [vmem:[%s1707_s13 + $0xa8] sm:$0xff]  ;;  %v1034_v35 = vld [vmem:[%s1707_s13 + $0x60] sm:$0xff] }
 0x1bb   :  { %v309_v6 = vadd.f32 %v1089_v57, %v308_v3  ;;  %v1526_v3 = vld [vmem:[%s1705_s9 + $0x8] sm:$0xff] }
 0x1bc   :  { %v1091_v8 = vpop.eup %1090  ;;  %654 = vmatpush.msrb.mxu1 %v1008_v36  ;;  %v1054_v36 = vld [vmem:[%s1707_s13 + $0xa0] sm:$0xff] }
 0x1bd   :  { %v313_v10 = vsel %vm312_vm13, %v1089_v57, %v309_v6  ;;  %v321_v11 = vmul.f32 %v1091_v8, %v274_v58  ;;  %vm326_vm15 = vweird.f32 %v1091_v8  ;;  %v1533_v6 = vld [vmem:[%s1705_s9 + $0x10] sm:$0xff] }
 0x1be   :  { %v318_v13 = vsel %vm315_vm14, %v317_v9, %v313_v10  ;;  %vm327_vm4 = vmor %vm325_vm3, %vm326_vm15  ;;  %655 = vmatpush.msrb.mxu1 %v1007_v37  ;;  %v743_v37 = vld [vmem:[%s1707_s13 + $0x18] sm:$0xff] }
 0x1bf   :  { %960 = vmatmul.msk.f32.gmra.mxu0 %vm60_vm0, %v318_v13  ;;  %v322_v14 = vsub.f32 1.0, %v321_v11 }
 0x1c0   :  { %656 = vmatpush.msrb.mxu1 %v1006_v38  ;;  %v1033_v38 = vld [vmem:[%s1707_s13 + $0x58] sm:$0xff] }
 0x1c1   :  { %v323_v17 = vmul.f32 %v1091_v8, %v322_v14 }
 0x1c2   :  { %657 = vmatpush.msrb.mxu1 %v1005_v39  ;;  %v1053_v39 = vld [vmem:[%s1707_s13 + $0x98] sm:$0xff] }
 0x1c3   :  { %v324_v23 = vadd.f32 %v1091_v8, %v323_v17  ;;  %v1561_v17 = vld [vmem:[%s1705_s9 + $0x30] sm:$0xff] }
 0x1c4   :  { %658 = vmatpush.msrb.mxu1 %v1004_v40  ;;  %v742_v40 = vld [vmem:[%s1707_s13 + $0x10] sm:$0xff] }
 0x1c5   :  { %v328_v25 = vsel %vm327_vm4, %v1091_v8, %v324_v23  ;;  %v1540_v8 = vld [vmem:[%s1705_s9 + $0x18] sm:$0xff] }
 0x1c6   :  { %v333_v26 = vsel %vm330_vm5, %v332_v24, %v328_v25  ;;  %659 = vmatpush.msrb.mxu1 %v1003_v41  ;;  %v747_v24 = vld [vmem:[%s1707_s13 + $0x38] sm:$0xff]  ;;  %v1032_v41 = vld [vmem:[%s1707_s13 + $0x50] sm:$0xff] }
 0x1c7   :  { %961 = vmatmul.msk.f32.gmra.mxu0 %vm60_vm0, %v333_v26  ;;  %v1037_v25 = vld [vmem:[%s1707_s13 + $0x78] sm:$0xff] }
 0x1c8   :  { %660 = vmatpush.msrb.mxu1 %v1002_v44  ;;  %v1057_v26 = vld [vmem:[%s1707_s13 + $0xb8] sm:$0xff]  ;;  %v741_v44 = vld [vmem:[%s1707_s13 + $0x8] sm:$0xff] }
 0x1cf   :  { %994 = vmatmul.msk.f32.vlgmr.msra.gmra.mxu0 %vm114_vm1, %v1233_v18 }
 0x1d7   :  { %995 = vmatmul.msk.f32.gmra.mxu0 %vm114_vm1, %v1240_v19 }
 0x1df   :  { %996 = vmatmul.msk.f32.gmra.mxu0 %vm114_vm1, %v1247_v20 }
 0x1e7   :  { %997 = vmatmul.msk.f32.gmra.mxu0 %vm114_vm1, %v1254_v21 }
 0x218   :  { %v1508_v51 = vpop.f32.mrf.mxu3 }
 0x220   :  { %v1510_v53 = vpop.f32.mrf.mxu3 }
 0x228   :  { %v1512_v56 = vpop.f32.mrf.mxu3 }
 0x22c   :  { %v366_v42 = vpop.f32.mrf.mxu0 }
 0x22d   :  { %v378_v43 = vmul.f32 %v366_v42, %v1233_v18  ;;  %v1052_v42 = vld [vmem:[%s1707_s13 + $0x90] sm:$0xff] }
 0x22f   :  { %982 = vmatmul.msk.f32.vlgmr.msrb.gmra.mxu2 %vm114_vm1, %v378_v43  ;;  %990 = vmatmul.msk.f32.vlgmr.msra.gmra.mxu1 %vm114_vm1, %v378_v43 }
 0x230   :  { %1018 = vmatmul.msk.f32.vlgmr.msrb.gmra.mxu3 %vm114_vm1, %v378_v43  ;;  %v1514_v58 = vpop.f32.mrf.mxu3  ;;  %826 = vmatpush.msra.mxu1 %v1037_v25 }
 0x232   :  { %827 = vmatpush.msra.mxu1 %v1036_v28 }
 0x234   :  { %v369_v45 = vpop.f32.mrf.mxu0  ;;  %828 = vmatpush.msra.mxu1 %v1035_v31 }
 0x235   :  { %v379_v46 = vmul.f32 %v369_v45, %v1240_v19  ;;  %v1031_v45 = vld [vmem:[%s1707_s13 + $0x48] sm:$0xff] }
 0x236   :  { %829 = vmatpush.msra.mxu1 %v1034_v35 }
 0x237   :  { %983 = vmatmul.msk.f32.gmra.mxu2 %vm114_vm1, %v379_v46  ;;  %991 = vmatmul.msk.f32.gmra.mxu1 %vm114_vm1, %v379_v46 }
 0x238   :  { %1019 = vmatmul.msk.f32.gmra.mxu3 %vm114_vm1, %v379_v46  ;;  %830 = vmatpush.msra.mxu1 %v1033_v38  ;;  %v1051_v46 = vld [vmem:[%s1707_s13 + $0x88] sm:$0xff] }
 0x23a   :  { %831 = vmatpush.msra.mxu1 %v1032_v41 }
 0x23c   :  { %v372_v47 = vpop.f32.mrf.mxu0  ;;  %832 = vmatpush.msra.mxu1 %v1031_v45 }
 0x23d   :  { %v380_v48 = vmul.f32 %v372_v47, %v1247_v20  ;;  %v740_v47 = vld [vmem:[%s1707_s13] sm:$0xff] }
 0x23f   :  { %984 = vmatmul.msk.f32.gmra.mxu2 %vm114_vm1, %v380_v48  ;;  %992 = vmatmul.msk.f32.gmra.mxu1 %vm114_vm1, %v380_v48 }
 0x240   :  { %1020 = vmatmul.msk.f32.gmra.mxu3 %vm114_vm1, %v380_v48  ;;  %v1030_v48 = vld [vmem:[%s1707_s13 + $0x40] sm:$0xff] }
 0x241   :  { %833 = vmatpush.msra.mxu1 %v1030_v48 }
 0x244   :  { %v375_v49 = vpop.f32.mrf.mxu0 }
 0x245   :  { %v381_v50 = vmul.f32 %v375_v49, %v1254_v21  ;;  %v1050_v49 = vld [vmem:[%s1707_s13 + $0x80] sm:$0xff] }
 0x247   :  { %985 = vmatmul.msk.f32.gmra.mxu2 %vm114_vm1, %v381_v50  ;;  %993 = vmatmul.msk.f32.gmra.mxu1 %vm114_vm1, %v381_v50 }
 0x248   :  { %1021 = vmatmul.msk.f32.gmra.mxu3 %vm114_vm1, %v381_v50 }
 0x24c   :  { %v541_v52 = vpop.f32.mrf.mxu0 }
 0x24f   :  { %1022 = vmatmul.msk.f32.vlgmr.msrb.gmra.mxu1 %vm114_vm1, %v1233_v18 }
 0x254   :  { %v544_v55 = vpop.f32.mrf.mxu0 }
 0x257   :  { %1023 = vmatmul.msk.f32.gmra.mxu1 %vm114_vm1, %v1240_v19 }
 0x25c   :  { %v547_v18 = vpop.f32.mrf.mxu0 }
 0x25f   :  { %1024 = vmatmul.msk.f32.gmra.mxu1 %vm114_vm1, %v1247_v20 }
 0x264   :  { %v550_v59 = vpop.f32.mrf.mxu0 }
 0x267   :  { %1025 = vmatmul.msk.f32.gmra.mxu1 %vm114_vm1, %v1254_v21 }
 0x2ac   :  { %v512_v54 = vpop.f32.mrf.mxu1 }
 0x2ad   :  { %v542_v63 = vadd.f32 %v541_v52, %v512_v54 }
 0x2b2   :  { %v438_v23 = vpop.f32.mrf.mxu2 }
 0x2b3   :  { %v633_v61 = vpop.f32.mrf.mxu3  ;;  %v468_v54 = vadd.f32 %v1508_v51, %v438_v23 }
 0x2b4   :  { %v515_v57 = vpop.f32.mrf.mxu1 }
 0x2b5   :  { %v545_v21 = vadd.f32 %v544_v55, %v515_v57  ;;  %v1074_v57 = vld [vmem:[%s1706_s12] ss:$0 sm:$0xff] }
 0x2ba   :  { %v441_v32 = vpop.f32.mrf.mxu2 }
 0x2bb   :  { %v636_v2 = vpop.f32.mrf.mxu3 }
 0x2bc   :  { %v518_v19 = vpop.f32.mrf.mxu1 }
 0x2bd   :  { %v548_v62 = vadd.f32 %v547_v18, %v518_v19 }
 0x2c2   :  { %v444_v43 = vpop.f32.mrf.mxu2 }
 0x2c3   :  { %v639_v5 = vpop.f32.mrf.mxu3 }
 0x2c4   :  { %v521_v60 = vpop.f32.mrf.mxu1 }
 0x2c5   :  { %v551_v20 = vadd.f32 %v550_v59, %v521_v60 }
 0x2c7   :  { %577 = vmatpush.msra.mxu2 %v551_v20  ;;  %v471_v20 = vadd.f32 %v1510_v53, %v441_v32 }
 0x2c9   :  { %578 = vmatpush.msra.mxu2 %v548_v62 }
 0x2ca   :  { %v447_v50 = vpop.f32.mrf.mxu2 }
 0x2cb   :  { %579 = vmatpush.msra.mxu2 %v545_v21  ;;  %v642_v9 = vpop.f32.mrf.mxu3 }
 0x2cc   :  { %v662_v1 = vpop.f32.mrf.mxu1 }
 0x2cd   :  { %580 = vmatpush.msra.mxu2 %v542_v63  ;;  %v663_v14 = vadd.f32 %v662_v1, %v633_v61 }
 0x2ce   :  { %998 = vmatmul.msk.f32.vlgmr.msra.gmra.mxu2 %vm156_vm2, %v1519_v0 }
 0x2cf   :  { %768 = vmatpush.msrb.mxu2 %v747_v24 }
 0x2d1   :  { %769 = vmatpush.msrb.mxu2 %v746_v27 }
 0x2d3   :  { %770 = vmatpush.msrb.mxu2 %v745_v30 }
 0x2d4   :  { %v665_v4 = vpop.f32.mrf.mxu1 }
 0x2d5   :  { %v666_v13 = vadd.f32 %v665_v4, %v636_v2  ;;  %771 = vmatpush.msrb.mxu2 %v744_v34  ;;  %v474_v2 = vadd.f32 %v1512_v56, %v444_v43 }
 0x2d6   :  { %999 = vmatmul.msk.f32.gmra.mxu2 %vm156_vm2, %v1526_v3 }
 0x2d7   :  { %772 = vmatpush.msrb.mxu2 %v743_v37 }
 0x2d9   :  { %773 = vmatpush.msrb.mxu2 %v742_v40 }
 0x2db   :  { %774 = vmatpush.msrb.mxu2 %v741_v44 }
 0x2dc   :  { %v668_v7 = vpop.f32.mrf.mxu1 }
 0x2dd   :  { %v669_v12 = vadd.f32 %v668_v7, %v639_v5  ;;  %775 = vmatpush.msrb.mxu2 %v740_v47 }
 0x2de   :  { %1000 = vmatmul.msk.f32.gmra.mxu2 %vm156_vm2, %v1533_v6 }
 0x2e4   :  { %v671_v10 = vpop.f32.mrf.mxu1 }
 0x2e5   :  { %v672_v11 = vadd.f32 %v671_v10, %v642_v9 }
 0x2e6   :  { %1001 = vmatmul.msk.f32.gmra.mxu2 %vm156_vm2, %v1540_v8 }
 0x2e7   :  { %698 = vmatpush.msrb.mxu0 %v672_v11  ;;  %v477_v11 = vadd.f32 %v1514_v58, %v447_v50 }
 0x2e9   :  { %699 = vmatpush.msrb.mxu0 %v669_v12 }
 0x2eb   :  { %700 = vmatpush.msrb.mxu0 %v666_v13 }
 0x2ed   :  { %701 = vmatpush.msrb.mxu0 %v663_v14 }
 0x2ee   :  { %1026 = vmatmul.msk.f32.vlgmr.msrb.gmra.mxu0 %vm156_vm2, %v1547_v15 }
 0x2ef   :  { %864 = vmatpush.msra.mxu0 %v1057_v26 }
 0x2f1   :  { %865 = vmatpush.msra.mxu0 %v1056_v29 }
 0x2f3   :  { %866 = vmatpush.msra.mxu0 %v1055_v33 }
 0x2f5   :  { %867 = vmatpush.msra.mxu0 %v1054_v36 }
 0x2f6   :  { %1027 = vmatmul.msk.f32.gmra.mxu0 %vm156_vm2, %v1554_v16 }
 0x2f7   :  { %868 = vmatpush.msra.mxu0 %v1053_v39 }
 0x2f9   :  { %869 = vmatpush.msra.mxu0 %v1052_v42 }
 0x2fb   :  { %870 = vmatpush.msra.mxu0 %v1051_v46 }
 0x2fd   :  { %871 = vmatpush.msra.mxu0 %v1050_v49 }
 0x2fe   :  { %1028 = vmatmul.msk.f32.gmra.mxu0 %vm156_vm2, %v1561_v17 }
 0x306   :  { %1029 = vmatmul.msk.f32.gmra.mxu0 %vm156_vm2, %v1568_v22 }
 0x351   :  { %v582_v52 = vpop.f32.mrf.mxu2 }
 0x352   :  { %v594_v55 = vadd.f32 %v582_v52, %v468_v54 }
 0x359   :  { %v585_v18 = vpop.f32.mrf.mxu2 }
 0x35a   :  { %v595_v62 = vadd.f32 %v585_v18, %v471_v20 }
 0x361   :  { %v588_v63 = vpop.f32.mrf.mxu2 }
 0x362   :  { %v596_v5 = vadd.f32 %v588_v63, %v474_v2 }
 0x369   :  { %v591_v10 = vpop.f32.mrf.mxu2 }
 0x36a   :  { %v597_v13 = vadd.f32 %v591_v10, %v477_v11 }
 0x36b   :  { %v703_v19 = vpop.f32.mrf.mxu0 }
 0x36c   :  { %v715_v59 = vadd.f32 %v703_v19, %v594_v55 }
 0x36e   :  { %v723_v60 = vadd.f32 %v1074_v57, %v715_v59 }
 0x370   :  { %v727_v61 = vmax.f32 %v723_v60, 0.0 }
 0x372   :  { %1038 = vmatmul.msk.f32.vlgmr.msrb.gmra.mxu2 %vm114_vm1, %v727_v61  ;;  %1046 = vmatmul.msk.f32.vlgmr.msra.gmra.mxu1 %vm114_vm1, %v727_v61 }
 0x373   :  { %1058 = vmatmul.msk.f32.vlgmr.msra.gmra.mxu0 %vm114_vm1, %v727_v61  ;;  %v706_v51 = vpop.f32.mrf.mxu0 }
 0x374   :  { %v716_v21 = vadd.f32 %v706_v51, %v595_v62 }
 0x376   :  { %v724_v1 = vadd.f32 %v1074_v57, %v716_v21 }
 0x378   :  { %v728_v4 = vmax.f32 %v724_v1, 0.0 }
 0x37a   :  { %1039 = vmatmul.msk.f32.gmra.mxu2 %vm114_vm1, %v728_v4  ;;  %1047 = vmatmul.msk.f32.gmra.mxu1 %vm114_vm1, %v728_v4 }
 0x37b   :  { %1059 = vmatmul.msk.f32.gmra.mxu0 %vm114_vm1, %v728_v4  ;;  %v709_v53 = vpop.f32.mrf.mxu0 }
 0x37c   :  { %v717_v7 = vadd.f32 %v709_v53, %v596_v5 }
 0x37e   :  { %v725_v9 = vadd.f32 %v1074_v57, %v717_v7 }
 0x380   :  { %v729_v12 = vmax.f32 %v725_v9, 0.0 }
 0x382   :  { %1040 = vmatmul.msk.f32.gmra.mxu2 %vm114_vm1, %v729_v12  ;;  %1048 = vmatmul.msk.f32.gmra.mxu1 %vm114_vm1, %v729_v12 }
 0x383   :  { %1060 = vmatmul.msk.f32.gmra.mxu0 %vm114_vm1, %v729_v12  ;;  %v712_v56 = vpop.f32.mrf.mxu0 }
 0x384   :  { %v718_v14 = vadd.f32 %v712_v56, %v597_v13 }
 0x386   :  { %v726_v23 = vadd.f32 %v1074_v57, %v718_v14 }
 0x388   :  { %v730_v24 = vmax.f32 %v726_v23, 0.0 }
 0x38a   :  { %1041 = vmatmul.msk.f32.gmra.mxu2 %vm114_vm1, %v730_v24  ;;  %1049 = vmatmul.msk.f32.gmra.mxu1 %vm114_vm1, %v730_v24 }
 0x38b   :  { %1061 = vmatmul.msk.f32.gmra.mxu0 %vm114_vm1, %v730_v24 }
 0x3f0   :  { %v873_v25 = vpop.f32.mrf.mxu0 }
 0x3f5   :  { %v777_v58 = vpop.f32.mrf.mxu2 }
 0x3f8   :  { %v876_v26 = vpop.f32.mrf.mxu0 }
 0x3fd   :  { %v780_v27 = vpop.f32.mrf.mxu2 }
 0x400   :  { %v879_v28 = vpop.f32.mrf.mxu0 }
 0x405   :  { %v783_v29 = vpop.f32.mrf.mxu2 }
 0x408   :  { %v882_v30 = vpop.f32.mrf.mxu0 }
 0x409   :  { %897 = vmatpush.msra.mxu2 %v882_v30 }
 0x40b   :  { %898 = vmatpush.msra.mxu2 %v879_v28 }
 0x40d   :  { %899 = vmatpush.msra.mxu2 %v876_v26  ;;  %v786_v31 = vpop.f32.mrf.mxu2 }
 0x40e   :  { %801 = vmatpush.msra.mxu3 %v786_v31 }
 0x40f   :  { %900 = vmatpush.msra.mxu2 %v873_v25 }
 0x410   :  { %802 = vmatpush.msra.mxu3 %v783_v29  ;;  %1062 = vmatmul.msk.f32.vlgmr.msra.gmra.mxu2 %vm156_vm2, %v1547_v15  ;;  %v835_v15 = vpop.f32.mrf.mxu1 }
 0x412   :  { %803 = vmatpush.msra.mxu3 %v780_v27 }
 0x414   :  { %804 = vmatpush.msra.mxu3 %v777_v58 }
 0x415   :  { %1042 = vmatmul.msk.f32.vlgmr.msra.gmra.mxu3 %vm156_vm2, %v1519_v0 }
 0x418   :  { %1063 = vmatmul.msk.f32.gmra.mxu2 %vm156_vm2, %v1554_v16  ;;  %v838_v16 = vpop.f32.mrf.mxu1 }
 0x41d   :  { %1043 = vmatmul.msk.f32.gmra.mxu3 %vm156_vm2, %v1526_v3  ;;  %v1075_v3 = vld [vmem:[%s1708_s14] ss:$0 sm:$0xff] }
 0x420   :  { %1064 = vmatmul.msk.f32.gmra.mxu2 %vm156_vm2, %v1561_v17  ;;  %v841_v37 = vpop.f32.mrf.mxu1 }
 0x425   :  { %1044 = vmatmul.msk.f32.gmra.mxu3 %vm156_vm2, %v1533_v6 }
 0x428   :  { %1065 = vmatmul.msk.f32.gmra.mxu2 %vm156_vm2, %v1568_v22  ;;  %v844_v45 = vpop.f32.mrf.mxu1 }
 0x42d   :  { %1045 = vmatmul.msk.f32.gmra.mxu3 %vm156_vm2, %v1540_v8 }
 0x493   :  { %v902_v0 = vpop.f32.mrf.mxu2 }
 0x498   :  { %v806_v32 = vpop.f32.mrf.mxu3 }
 0x499   :  { %v836_v33 = vadd.f32 %v835_v15, %v806_v32 }
 0x49b   :  { %v914_v34 = vadd.f32 %v902_v0, %v836_v33  ;;  %v905_v17 = vpop.f32.mrf.mxu2 }
 0x49d   :  { %v922_v35 = vadd.f32 %v1075_v3, %v914_v34 }
 0x49f   :  { %v926_v36 = vmax.f32 %v922_v35, 0.0 }
 0x4a0   :  { %v809_v6 = vpop.f32.mrf.mxu3 }
 0x4a1   :  { %930 = vst [vmem:[%s1709_s15] sm:$0xff] %v926_v36  ;;  %v839_v22 = vadd.f32 %v838_v16, %v809_v6 }
 0x4a3   :  { %v915_v8 = vadd.f32 %v905_v17, %v839_v22  ;;  %v908_v39 = vpop.f32.mrf.mxu2 }
 0x4a5   :  { %v923_v38 = vadd.f32 %v1075_v3, %v915_v8 }
 0x4a7   :  { %v927_v40 = vmax.f32 %v923_v38, 0.0 }
 0x4a8   :  { %v812_v41 = vpop.f32.mrf.mxu3 }
 0x4a9   :  { %931 = vst [vmem:[%s1709_s15 + $0x8] sm:$0xff] %v927_v40  ;;  %v842_v42 = vadd.f32 %v841_v37, %v812_v41 }
 0x4ab   :  { %v916_v43 = vadd.f32 %v908_v39, %v842_v42  ;;  %v911_v48 = vpop.f32.mrf.mxu2 }
 0x4ad   :  { %v924_v44 = vadd.f32 %v1075_v3, %v916_v43 }
 0x4af   :  { %v928_v46 = vmax.f32 %v924_v44, 0.0 }
 0x4b0   :  { %v815_v47 = vpop.f32.mrf.mxu3 }
 0x4b1   :  { %932 = vst [vmem:[%s1709_s15 + $0x10] sm:$0xff] %v928_v46  ;;  %v845_v49 = vadd.f32 %v844_v45, %v815_v47 }
 0x4b3   :  { %v917_v50 = vadd.f32 %v911_v48, %v845_v49 }
 0x4b5   :  { %v925_v52 = vadd.f32 %v1075_v3, %v917_v50 }
 0x4b7   :  { %v929_v54 = vmax.f32 %v925_v52, 0.0 }
 0x4b9   :  { %933 = vst [vmem:[%s1709_s15 + $0x18] sm:$0xff] %v929_v54 }

</bundles_post_ra>
